<compile_context>
chip_gen: v6e
topology: v6e:2x2x1
jax: 0.10.0
libtpu: 0.0.40
codegen_flags: <defaults>
</compile_context>

<pallas_src>
import functools
import jax
import jax.numpy as jnp
from jax.experimental import pallas as pl
from jax.experimental.pallas import tpu as pltpu


def _round_up(x, m):
    return ((x + m - 1) // m) * m


# --------------------------------------------------------------------------------------
# Pallas kernels
# --------------------------------------------------------------------------------------

def _sage_kernel(x_ref, a_ref, wr_ref, wl_ref, b_ref, o_ref):
    # o = relu(x @ w_r + agg @ w_l + b)  — one fused SAGEConv layer tile.
    # Weights are bf16 (pre-cast once); activations cast to bf16 at the dot inputs,
    # f32 accumulate, epilogue in f32 (v5e has no bf16 VPU).
    xb = x_ref[...].astype(jnp.bfloat16)
    ab = a_ref[...].astype(jnp.bfloat16)
    acc = jnp.dot(xb, wr_ref[...], preferred_element_type=jnp.float32)
    acc = acc + jnp.dot(ab, wl_ref[...], preferred_element_type=jnp.float32)
    o_ref[...] = jnp.maximum(acc + b_ref[...], 0.0)


def _fused_head_kernel(n_layers, *refs):
    # refs = (x, w0, b0, w1, b1, ..., out).  Chain of GEMM + bias + ReLU; all
    # intermediates live in VMEM/vregs, nothing goes back to HBM between layers.
    x_ref = refs[0]
    o_ref = refs[-1]
    h = x_ref[...]
    for i in range(n_layers):
        w_ref = refs[1 + 2 * i]
        b_ref = refs[2 + 2 * i]
        acc = jnp.dot(h.astype(jnp.bfloat16), w_ref[...],
                      preferred_element_type=jnp.float32)
        h = jnp.maximum(acc + b_ref[...], 0.0)
    o_ref[...] = h


# --------------------------------------------------------------------------------------
# Kernel wrappers
# --------------------------------------------------------------------------------------

def sage_layer(x_pad, agg_pad, wr, wl, b, tile_m):
    """relu(x @ w_r + agg @ w_l + b), M-tiled grid, weights VMEM-resident."""
    mp, kp = x_pad.shape
    np_ = wr.shape[1]
    grid = (mp // tile_m,)
    return pl.pallas_call(
        _sage_kernel,
        out_shape=jax.ShapeDtypeStruct((mp, np_), jnp.float32),
        grid=grid,
        in_specs=[
            pl.BlockSpec((tile_m, kp), lambda i: (i, 0)),
            pl.BlockSpec((tile_m, kp), lambda i: (i, 0)),
            pl.BlockSpec((kp, np_), lambda i: (0, 0)),
            pl.BlockSpec((kp, np_), lambda i: (0, 0)),
            pl.BlockSpec((1, np_), lambda i: (0, 0)),
        ],
        out_specs=pl.BlockSpec((tile_m, np_), lambda i: (i, 0)),
        compiler_params=pltpu.CompilerParams(dimension_semantics=("parallel",)),
        cost_estimate=pl.CostEstimate(
            flops=4 * mp * kp * np_,
            transcendentals=0,
            bytes_accessed=4 * (2 * mp * kp + np_ + mp * np_) + 2 * (2 * kp * np_),
        ),
    )(x_pad, agg_pad, wr, wl, b)


def fused_head(x_pad, head_w, head_b, tile_b):
    """Single fused kernel for the whole post-SortPool head (convs + dense + output),
    tiled over graphs; the full (bf16) weight chain stays VMEM-resident per tile."""
    mp, dp0 = x_pad.shape
    n_layers = len(head_w)
    np_out = head_w[-1].shape[1]
    grid = (mp // tile_b,)

    in_specs = [pl.BlockSpec((tile_b, dp0), lambda i: (i, 0))]
    operands = [x_pad]
    flops = 0
    bytes_accessed = 4 * (mp * dp0 + mp * np_out)
    d_in = dp0
    for w, b in zip(head_w, head_b):
        in_specs.append(pl.BlockSpec(w.shape, lambda i: (0, 0)))
        in_specs.append(pl.BlockSpec(b.shape, lambda i: (0, 0)))
        operands.extend([w, b])
        flops += 2 * mp * w.shape[0] * w.shape[1]
        bytes_accessed += 2 * w.size + 4 * b.size
        d_in = w.shape[1]

    out = pl.pallas_call(
        functools.partial(_fused_head_kernel, n_layers),
        out_shape=jax.ShapeDtypeStruct((mp, np_out), jnp.float32),
        grid=grid,
        in_specs=in_specs,
        out_specs=pl.BlockSpec((tile_b, np_out), lambda i: (i, 0)),
        compiler_params=pltpu.CompilerParams(dimension_semantics=("parallel",)),
        cost_estimate=pl.CostEstimate(
            flops=int(flops), transcendentals=0, bytes_accessed=int(bytes_accessed)
        ),
    )(*operands)
    return out


# --------------------------------------------------------------------------------------
# Glue (gather/scatter, sort-pooling) — plain JAX
# --------------------------------------------------------------------------------------

def neighbor_mean(x, src, dst, num_nodes, inv_deg):
    """Mean of source-node features over incoming edges per destination node.
    inv_deg is hoisted out of the layer loop (loop-invariant)."""
    # TODO(synk): fuse this gather/scatter into the SAGE kernel via
    # PrefetchScalarGridSpec (CSR offsets in SMEM) + manual pltpu.make_async_copy
    # gathers per M-tile, so x is read from HBM once per layer.
    msg_sum = jax.ops.segment_sum(x[src], dst, num_segments=num_nodes)
    return msg_sum * inv_deg[:, None]


def sort_pool(x, batch, num_graphs, k):
    """PyG SortAggregation: per-graph descending sort by last channel, top-k, zero-pad.
    Returns dense (num_graphs, k, C)."""
    N, C = x.shape
    key = x[:, -1]
    order = jnp.lexsort((-key, batch))  # primary: graph id asc, secondary: key desc
    x_sorted = x[order]
    batch_sorted = batch[order]
    counts = jax.ops.segment_sum(jnp.ones((N,), jnp.int32), batch, num_segments=num_graphs)
    starts = jnp.concatenate([jnp.zeros((1,), jnp.int32), jnp.cumsum(counts)[:-1]])
    pos = jnp.arange(N, dtype=jnp.int32) - starts[batch_sorted]
    dense = jnp.zeros((num_graphs, k, C), jnp.float32)
    # positions >= k fall out of bounds along axis 1 and are dropped
    dense = dense.at[batch_sorted, pos].set(x_sorted, mode="drop")
    return dense


# --------------------------------------------------------------------------------------
# One-time parameter preprocessing (loop-invariant: split / lower-to-GEMM / pad / bf16)
# --------------------------------------------------------------------------------------

def preprocess_params(params, sort_pool_k):
    """Preprocess weights once so the per-forward path only pads activations once.

    - SAGE:   w_r.T (self) and w_l.T (agg) kept as two padded (C_in_pad, C_out_pad)
              bf16 operands; bias zero-padded f32.  Padded regions are exactly zero so
              padded rows/cols of activations contribute nothing and stay zero.
    - conv1d: lowered to a block-banded dense matrix over the flattened (L, C) sequence.
              The LAST conv layer emits PyTorch's (C, L) flatten order so the dense
              weights keep their native PyTorch layout.
    - dense:  transposed once to (in, out), zero-padded, cast to bf16.
    """
    sage_wr, sage_wl, sage_b, sage_out_dims = [], [], [], []
    for (w_l, b_l, w_r) in params["sage"]:
        c_out, c_in = w_l.shape
        kp = _round_up(c_in, 128)
        np_ = _round_up(c_out, 128)
        wr_pad = jnp.zeros((kp, np_), jnp.float32).at[:c_in, :c_out].set(w_r.T)
        wl_pad = jnp.zeros((kp, np_), jnp.float32).at[:c_in, :c_out].set(w_l.T)
        sage_wr.append(wr_pad.astype(jnp.bfloat16))
        sage_wl.append(wl_pad.astype(jnp.bfloat16))
        sage_b.append(jnp.zeros((1, np_), jnp.float32).at[0, :c_out].set(b_l))
        sage_out_dims.append(c_out)

    # Build the unpadded head chain: conv1d layers as big GEMMs, then dense layers.
    # TODO(synk): for large sort_pool_k, replace the dense block-banded conv-as-GEMM
    # with per-tap small dots inside the head kernel to avoid multiplying zeros.
    head = []
    length = sort_pool_k
    n_conv = len(params["conv1d"])
    for idx, (w, b) in enumerate(params["conv1d"]):
        c_out, c_in, ksz = w.shape
        l_out = length - ksz + 1
        last = idx == n_conv - 1
        w_big = jnp.zeros((length * c_in, l_out * c_out), jnp.float32)
        w_kio = jnp.transpose(w, (2, 1, 0))                    # (K, c_in, c_out)
        for t in range(l_out):
            for kk in range(ksz):
                rows = slice((t + kk) * c_in, (t + kk + 1) * c_in)
                if last:
                    # output index cout*l_out + t  (PyTorch (C, L) flatten order)
                    w_big = w_big.at[rows, t::l_out].set(w_kio[kk])
                else:
                    # output index t*c_out + cout  (internal (L, C) order)
                    w_big = w_big.at[rows, t * c_out:(t + 1) * c_out].set(w_kio[kk])
        b_big = jnp.repeat(b, l_out) if last else jnp.tile(b, l_out)
        head.append((w_big, b_big))
        length = l_out

    for (w, b) in params["dense"]:
        head.append((w.T, b))
    w, b = params["out"]
    head.append((w.T, b))

    head_w, head_b = [], []
    for (w, b) in head:
        d_in, d_out = w.shape
        dp_in, dp_out = _round_up(d_in, 128), _round_up(d_out, 128)
        w_pad = jnp.zeros((dp_in, dp_out), jnp.float32).at[:d_in, :d_out].set(w)
        head_w.append(w_pad.astype(jnp.bfloat16))
        head_b.append(jnp.zeros((1, dp_out), jnp.float32).at[0, :d_out].set(b))

    plan = {"sage_wr": sage_wr, "sage_wl": sage_wl, "sage_b": sage_b,
            "head_w": head_w, "head_b": head_b}
    return plan, tuple(sage_out_dims)


# --------------------------------------------------------------------------------------
# DGCNN forward
# --------------------------------------------------------------------------------------

@functools.partial(
    jax.jit,
    static_argnames=("num_graphs", "sort_pool_k", "sage_out_dims", "num_outputs"),
)
def dgcnn_forward(plan, x, edge_index, batch, *, num_graphs, sort_pool_k,
                  sage_out_dims, num_outputs):
    # NaN imputation with global nanmean (torch.nanmean over all elements)
    mean_value = jnp.nanmean(x)
    x = jnp.where(jnp.isnan(x), mean_value, x)
    n_nodes = x.shape[0]
    src, dst = edge_index[0], edge_index[1]

    # Row padding is applied ONCE and kept resident across all SAGE layers.
    tile_m = 512 if n_nodes >= 512 else _round_up(n_nodes, 8)
    mp = _round_up(n_nodes, tile_m)
    kp0 = plan["sage_wr"][0].shape[0]
    x_pad = jnp.zeros((mp, kp0), jnp.float32).at[:n_nodes, :x.shape[1]].set(x)

    # Loop-invariant aggregation terms (degree / reciprocal) hoisted out of the loop.
    deg = jax.ops.segment_sum(jnp.ones((src.shape[0],), jnp.float32), dst,
                              num_segments=mp)
    inv_deg = 1.0 / jnp.maximum(deg, 1.0)

    # SAGEConv stack + ReLU: one fused dual-GEMM kernel per layer on (x, mean_agg).
    # Padded columns stay exactly zero (zero weight cols + zero bias), padded rows are
    # never referenced by edges and are sliced off once before sort_pool.
    for wr, wl, b in zip(plan["sage_wr"], plan["sage_wl"], plan["sage_b"]):
        agg = neighbor_mean(x_pad, src, dst, mp, inv_deg)
        x_pad = sage_layer(x_pad, agg, wr, wl, b, tile_m)

    # SortPooling -> (B, k, C); flatten in (L, C) order (the fused conv-as-GEMM weights
    # were built to consume exactly this order; the last conv restores PyTorch's (C, L)
    # flatten order for the dense layers).
    c_last = sage_out_dims[-1]
    x_nodes = x_pad[:n_nodes, :c_last]
    dense = sort_pool(x_nodes, batch, num_graphs, sort_pool_k)
    z = dense.reshape(num_graphs, -1)

    # Fully fused post-SortPool head in a single Pallas kernel (row-tiled grid):
    # conv1d layers (as flattened block-banded GEMMs) + dense layers + output layer,
    # each followed by ReLU (including the output layer, matching the reference).
    # Dropout is identity in eval mode.
    tile_b = 128 if num_graphs >= 128 else _round_up(num_graphs, 8)
    bp = _round_up(num_graphs, tile_b)
    dp0 = plan["head_w"][0].shape[0]
    z_pad = jnp.zeros((bp, dp0), jnp.float32).at[:num_graphs, :z.shape[1]].set(z)
    out = fused_head(z_pad, plan["head_w"], plan["head_b"], tile_b)
    return out[:num_graphs, :num_outputs]


# --------------------------------------------------------------------------------------
# Deterministic parameter construction (PyTorch-layout weights)
# --------------------------------------------------------------------------------------

def make_params(key, num_features, graph_conv_sizes, conv1d_sizes, dense_sizes,
                num_outputs, sort_pool_k):
    kernel_size = min(sort_pool_k, len(graph_conv_sizes))
    keys = iter(jax.random.split(key, 64))

    def lin(out_f, in_f):
        return 0.1 * jax.random.normal(next(keys), (out_f, in_f), jnp.float32)

    def vec(out_f):
        return 0.05 * jax.random.normal(next(keys), (out_f,), jnp.float32)

    params = {"sage": [], "conv1d": [], "dense": []}

    sizes = [num_features] + list(graph_conv_sizes)
    for i_in, i_out in zip(sizes[:-1], sizes[1:]):
        # PyG SAGEConv (mean aggr): (lin_l weight, lin_l bias, lin_r weight)
        params["sage"].append((lin(i_out, i_in), vec(i_out), lin(i_out, i_in)))

    c_sizes = [graph_conv_sizes[-1]] + list(conv1d_sizes)
    for c_in, c_out in zip(c_sizes[:-1], c_sizes[1:]):
        w = 0.1 * jax.random.normal(next(keys), (c_out, c_in, kernel_size), jnp.float32)
        params["conv1d"].append((w, vec(c_out)))

    lin_in = dense_sizes[0] * (sort_pool_k - kernel_size + 1)
    d_sizes = [lin_in] + list(dense_sizes)
    for d_in, d_out in zip(d_sizes[:-1], d_sizes[1:]):
        params["dense"].append((lin(d_out, d_in), vec(d_out)))

    params["out"] = (lin(num_outputs, dense_sizes[-1]), vec(num_outputs))
    return params


# --------------------------------------------------------------------------------------
# Main
# --------------------------------------------------------------------------------------

if __name__ == "__main__":
    # Hyperparameters (chosen so the reference module's shapes are self-consistent):
    NUM_FEATURES = 6                  # dataset.num_node_features
    GRAPH_CONV_SIZES = [32, 32, 32]   # -> KERNEL_SIZE = min(8, 3) = 3
    SORT_POOL_K = 8
    CONV1D_SIZES = [32, 48]           # (B,32,8)->(B,32,6)->(B,48,4) -> flatten 192
    DENSE_SIZES = [32, 16]            # linear in = 32*(8-3+1) = 192  (matches)
    NUM_ACTIVITIES = 5

    key = jax.random.PRNGKey(0)
    k_param, k_x = jax.random.split(key)

    params = make_params(k_param, NUM_FEATURES, GRAPH_CONV_SIZES, CONV1D_SIZES,
                         DENSE_SIZES, NUM_ACTIVITIES, SORT_POOL_K)
    plan, sage_out_dims = preprocess_params(params, SORT_POOL_K)

    # Two graphs: 5 nodes + 7 nodes = 12 nodes total
    num_graphs = 2
    N = 12
    x = jax.random.normal(k_x, (N, NUM_FEATURES), jnp.float32)
    # inject NaNs to exercise the nanmean imputation
    x = x.at[0, 0].set(jnp.nan).at[7, 3].set(jnp.nan)

    src = jnp.array([0, 1, 2, 3, 0, 4, 5, 6, 7, 8, 9, 10, 5, 11, 7], jnp.int32)
    dst = jnp.array([1, 2, 3, 4, 2, 0, 6, 7, 8, 9, 10, 11, 11, 5, 9], jnp.int32)
    edge_index = jnp.stack([src, dst])
    batch = jnp.array([0] * 5 + [1] * 7, jnp.int32)

    out = dgcnn_forward(plan, x, edge_index, batch,
                        num_graphs=num_graphs, sort_pool_k=SORT_POOL_K,
                        sage_out_dims=sage_out_dims, num_outputs=NUM_ACTIVITIES)
    out = jax.block_until_ready(out)
    assert out.shape == (num_graphs, NUM_ACTIVITIES)
    assert bool(jnp.all(jnp.isfinite(out)))
    # TODO(synk): dropout is evaluated in inference mode (identity); training-mode dropout
    # would need pltpu.prng_seed / prng_random_bits inside the fused head kernel.
    print("KERNEL_OK")
</pallas_src>

<mosaic_0001>
module attributes {stable_mosaic.version = 11 : i64} {
  func.func @_sage_kernel(%arg0: i32, %arg1: memref<16x128xf32, #tpu.memory_space<vmem>>, %arg2: memref<16x128xf32, #tpu.memory_space<vmem>>, %arg3: memref<128x128xbf16, #tpu.memory_space<vmem>>, %arg4: memref<128x128xbf16, #tpu.memory_space<vmem>>, %arg5: memref<1x128xf32, #tpu.memory_space<vmem>>, %arg6: memref<16x128xf32, #tpu.memory_space<vmem>>) attributes {dimension_semantics = [#tpu.dimension_semantics<parallel>], iteration_bounds = array<i64: 1>, scalar_prefetch = 0 : i64, scratch_operands = 0 : i64, tpu.core_type = #tpu.core_type<tc>, window_params = [{transform_indices = @transform_0, window_bounds = array<i64: 16, 128>}, {transform_indices = @transform_1, window_bounds = array<i64: 16, 128>}, {pipeline_mode = #tpu.pipeline_mode<synchronous>, transform_indices = @transform_2, window_bounds = array<i64: 128, 128>}, {pipeline_mode = #tpu.pipeline_mode<synchronous>, transform_indices = @transform_3, window_bounds = array<i64: 128, 128>}, {pipeline_mode = #tpu.pipeline_mode<synchronous>, transform_indices = @transform_4, window_bounds = array<i64: 1, 128>}, {transform_indices = @transform_5, window_bounds = array<i64: 16, 128>}]} {
    %c0 = arith.constant 0 : index
    %c0_0 = arith.constant 0 : index
    %0 = vector.load %arg1[%c0, %c0_0] : memref<16x128xf32, #tpu.memory_space<vmem>>, vector<16x128xf32>
    %1 = arith.truncf %0 : vector<16x128xf32> to vector<16x128xbf16>
    %c0_1 = arith.constant 0 : index
    %c0_2 = arith.constant 0 : index
    %2 = vector.load %arg2[%c0_1, %c0_2] : memref<16x128xf32, #tpu.memory_space<vmem>>, vector<16x128xf32>
    %3 = arith.truncf %2 : vector<16x128xf32> to vector<16x128xbf16>
    %c0_3 = arith.constant 0 : index
    %c0_4 = arith.constant 0 : index
    %4 = vector.load %arg3[%c0_3, %c0_4] : memref<128x128xbf16, #tpu.memory_space<vmem>>, vector<128x128xbf16>
    %cst = arith.constant dense<0.000000e+00> : vector<16x128xf32>
    %5 = tpu.matmul %1, %4, %cst {dimension_numbers = #tpu.dot_dimension_numbers<[1], [0], [0], [1], [0, 0, 1, 1], [], []>} : vector<16x128xbf16>, vector<128x128xbf16>, vector<16x128xf32> -> vector<16x128xf32>
    %c0_5 = arith.constant 0 : index
    %c0_6 = arith.constant 0 : index
    %6 = vector.load %arg4[%c0_5, %c0_6] : memref<128x128xbf16, #tpu.memory_space<vmem>>, vector<128x128xbf16>
    %cst_7 = arith.constant dense<0.000000e+00> : vector<16x128xf32>
    %7 = tpu.matmul %3, %6, %cst_7 {dimension_numbers = #tpu.dot_dimension_numbers<[1], [0], [0], [1], [0, 0, 1, 1], [], []>} : vector<16x128xbf16>, vector<128x128xbf16>, vector<16x128xf32> -> vector<16x128xf32>
    %8 = arith.addf %5, %7 : vector<16x128xf32>
    %c0_8 = arith.constant 0 : index
    %c0_9 = arith.constant 0 : index
    %9 = vector.load %arg5[%c0_8, %c0_9] : memref<1x128xf32, #tpu.memory_space<vmem>>, vector<1x128xf32>
    %10 = vector.broadcast %9 : vector<1x128xf32> to vector<16x128xf32>
    %11 = arith.addf %8, %10 : vector<16x128xf32>
    %cst_10 = arith.constant 0.000000e+00 : f32
    %12 = vector.broadcast %cst_10 : f32 to vector<16x128xf32>
    %13 = arith.maximumf %11, %12 : vector<16x128xf32>
    %c0_11 = arith.constant 0 : index
    %c0_12 = arith.constant 0 : index
    %14 = vector.load %arg6[%c0_11, %c0_12] : memref<16x128xf32, #tpu.memory_space<vmem>>, vector<16x128xf32>
    tpu.vector_store %arg6[%c0_11, %c0_12], %13 {strides = array<i32>} : memref<16x128xf32, #tpu.memory_space<vmem>>, vector<16x128xf32>,
    return
  }
  func.func @transform_0(%arg0: i32) -> (i32, i32) {
    %c0_i32 = arith.constant 0 : i32
    %c0_i32_0 = arith.constant 0 : i32
    return %arg0, %c0_i32 : i32, i32
  }
  func.func @transform_1(%arg0: i32) -> (i32, i32) {
    %c0_i32 = arith.constant 0 : i32
    %c0_i32_0 = arith.constant 0 : i32
    return %arg0, %c0_i32 : i32, i32
  }
  func.func @transform_2(%arg0: i32) -> (i32, i32) {
    %c0_i32 = arith.constant 0 : i32
    %c0_i32_0 = arith.constant 0 : i32
    %c0_i32_1 = arith.constant 0 : i32
    return %c0_i32, %c0_i32_0 : i32, i32
  }
  func.func @transform_3(%arg0: i32) -> (i32, i32) {
    %c0_i32 = arith.constant 0 : i32
    %c0_i32_0 = arith.constant 0 : i32
    %c0_i32_1 = arith.constant 0 : i32
    return %c0_i32, %c0_i32_0 : i32, i32
  }
  func.func @transform_4(%arg0: i32) -> (i32, i32) {
    %c0_i32 = arith.constant 0 : i32
    %c0_i32_0 = arith.constant 0 : i32
    %c0_i32_1 = arith.constant 0 : i32
    return %c0_i32, %c0_i32_0 : i32, i32
  }
  func.func @transform_5(%arg0: i32) -> (i32, i32) {
    %c0_i32 = arith.constant 0 : i32
    %c0_i32_0 = arith.constant 0 : i32
    return %arg0, %c0_i32 : i32, i32
  }
}

module attributes {stable_mosaic.version = 11 : i64} {
  func.func @_fused_head_kernel(%arg0: i32, %arg1: memref<8x256xf32, #tpu.memory_space<vmem>>, %arg2: memref<256x256xbf16, #tpu.memory_space<vmem>>, %arg3: memref<1x256xf32, #tpu.memory_space<vmem>>, %arg4: memref<256x256xbf16, #tpu.memory_space<vmem>>, %arg5: memref<1x256xf32, #tpu.memory_space<vmem>>, %arg6: memref<256x128xbf16, #tpu.memory_space<vmem>>, %arg7: memref<1x128xf32, #tpu.memory_space<vmem>>, %arg8: memref<128x128xbf16, #tpu.memory_space<vmem>>, %arg9: memref<1x128xf32, #tpu.memory_space<vmem>>, %arg10: memref<128x128xbf16, #tpu.memory_space<vmem>>, %arg11: memref<1x128xf32, #tpu.memory_space<vmem>>, %arg12: memref<8x128xf32, #tpu.memory_space<vmem>>) attributes {dimension_semantics = [#tpu.dimension_semantics<parallel>], iteration_bounds = array<i64: 1>, scalar_prefetch = 0 : i64, scratch_operands = 0 : i64, tpu.core_type = #tpu.core_type<tc>, window_params = [{transform_indices = @transform_0, window_bounds = array<i64: 8, 256>}, {pipeline_mode = #tpu.pipeline_mode<synchronous>, transform_indices = @transform_1, window_bounds = array<i64: 256, 256>}, {pipeline_mode = #tpu.pipeline_mode<synchronous>, transform_indices = @transform_2, window_bounds = array<i64: 1, 256>}, {pipeline_mode = #tpu.pipeline_mode<synchronous>, transform_indices = @transform_3, window_bounds = array<i64: 256, 256>}, {pipeline_mode = #tpu.pipeline_mode<synchronous>, transform_indices = @transform_4, window_bounds = array<i64: 1, 256>}, {pipeline_mode = #tpu.pipeline_mode<synchronous>, transform_indices = @transform_5, window_bounds = array<i64: 256, 128>}, {pipeline_mode = #tpu.pipeline_mode<synchronous>, transform_indices = @transform_6, window_bounds = array<i64: 1, 128>}, {pipeline_mode = #tpu.pipeline_mode<synchronous>, transform_indices = @transform_7, window_bounds = array<i64: 128, 128>}, {pipeline_mode = #tpu.pipeline_mode<synchronous>, transform_indices = @transform_8, window_bounds = array<i64: 1, 128>}, {pipeline_mode = #tpu.pipeline_mode<synchronous>, transform_indices = @transform_9, window_bounds = array<i64: 128, 128>}, {pipeline_mode = #tpu.pipeline_mode<synchronous>, transform_indices = @transform_10, window_bounds = array<i64: 1, 128>}, {transform_indices = @transform_11, window_bounds = array<i64: 8, 128>}]} {
    %c0 = arith.constant 0 : index
    %c0_0 = arith.constant 0 : index
    %0 = vector.load %arg1[%c0, %c0_0] : memref<8x256xf32, #tpu.memory_space<vmem>>, vector<8x256xf32>
    %1 = arith.truncf %0 : vector<8x256xf32> to vector<8x256xbf16>
    %c0_1 = arith.constant 0 : index
    %c0_2 = arith.constant 0 : index
    %2 = vector.load %arg2[%c0_1, %c0_2] : memref<256x256xbf16, #tpu.memory_space<vmem>>, vector<256x256xbf16>
    %cst = arith.constant dense<0.000000e+00> : vector<8x256xf32>
    %3 = tpu.matmul %1, %2, %cst {dimension_numbers = #tpu.dot_dimension_numbers<[1], [0], [0], [1], [0, 0, 1, 1], [], []>} : vector<8x256xbf16>, vector<256x256xbf16>, vector<8x256xf32> -> vector<8x256xf32>
    %c0_3 = arith.constant 0 : index
    %c0_4 = arith.constant 0 : index
    %4 = vector.load %arg3[%c0_3, %c0_4] : memref<1x256xf32, #tpu.memory_space<vmem>>, vector<1x256xf32>
    %5 = vector.broadcast %4 : vector<1x256xf32> to vector<8x256xf32>
    %6 = arith.addf %3, %5 : vector<8x256xf32>
    %cst_5 = arith.constant 0.000000e+00 : f32
    %7 = vector.broadcast %cst_5 : f32 to vector<8x256xf32>
    %8 = arith.maximumf %6, %7 : vector<8x256xf32>
    %9 = arith.truncf %8 : vector<8x256xf32> to vector<8x256xbf16>
    %c0_6 = arith.constant 0 : index
    %c0_7 = arith.constant 0 : index
    %10 = vector.load %arg4[%c0_6, %c0_7] : memref<256x256xbf16, #tpu.memory_space<vmem>>, vector<256x256xbf16>
    %cst_8 = arith.constant dense<0.000000e+00> : vector<8x256xf32>
    %11 = tpu.matmul %9, %10, %cst_8 {dimension_numbers = #tpu.dot_dimension_numbers<[1], [0], [0], [1], [0, 0, 1, 1], [], []>} : vector<8x256xbf16>, vector<256x256xbf16>, vector<8x256xf32> -> vector<8x256xf32>
    %c0_9 = arith.constant 0 : index
    %c0_10 = arith.constant 0 : index
    %12 = vector.load %arg5[%c0_9, %c0_10] : memref<1x256xf32, #tpu.memory_space<vmem>>, vector<1x256xf32>
    %13 = vector.broadcast %12 : vector<1x256xf32> to vector<8x256xf32>
    %14 = arith.addf %11, %13 : vector<8x256xf32>
    %cst_11 = arith.constant 0.000000e+00 : f32
    %15 = vector.broadcast %cst_11 : f32 to vector<8x256xf32>
    %16 = arith.maximumf %14, %15 : vector<8x256xf32>
    %17 = arith.truncf %16 : vector<8x256xf32> to vector<8x256xbf16>
    %c0_12 = arith.constant 0 : index
    %c0_13 = arith.constant 0 : index
    %18 = vector.load %arg6[%c0_12, %c0_13] : memref<256x128xbf16, #tpu.memory_space<vmem>>, vector<256x128xbf16>
    %cst_14 = arith.constant dense<0.000000e+00> : vector<8x128xf32>
    %19 = tpu.matmul %17, %18, %cst_14 {dimension_numbers = #tpu.dot_dimension_numbers<[1], [0], [0], [1], [0, 0, 1, 1], [], []>} : vector<8x256xbf16>, vector<256x128xbf16>, vector<8x128xf32> -> vector<8x128xf32>
    %c0_15 = arith.constant 0 : index
    %c0_16 = arith.constant 0 : index
    %20 = vector.load %arg7[%c0_15, %c0_16] : memref<1x128xf32, #tpu.memory_space<vmem>>, vector<1x128xf32>
    %21 = vector.broadcast %20 : vector<1x128xf32> to vector<8x128xf32>
    %22 = arith.addf %19, %21 : vector<8x128xf32>
    %cst_17 = arith.constant 0.000000e+00 : f32
    %23 = vector.broadcast %cst_17 : f32 to vector<8x128xf32>
    %24 = arith.maximumf %22, %23 : vector<8x128xf32>
    %25 = arith.truncf %24 : vector<8x128xf32> to vector<8x128xbf16>
    %c0_18 = arith.constant 0 : index
    %c0_19 = arith.constant 0 : index
    %26 = vector.load %arg8[%c0_18, %c0_19] : memref<128x128xbf16, #tpu.memory_space<vmem>>, vector<128x128xbf16>
    %cst_20 = arith.constant dense<0.000000e+00> : vector<8x128xf32>
    %27 = tpu.matmul %25, %26, %cst_20 {dimension_numbers = #tpu.dot_dimension_numbers<[1], [0], [0], [1], [0, 0, 1, 1], [], []>} : vector<8x128xbf16>, vector<128x128xbf16>, vector<8x128xf32> -> vector<8x128xf32>
    %c0_21 = arith.constant 0 : index
    %c0_22 = arith.constant 0 : index
    %28 = vector.load %arg9[%c0_21, %c0_22] : memref<1x128xf32, #tpu.memory_space<vmem>>, vector<1x128xf32>
    %29 = vector.broadcast %28 : vector<1x128xf32> to vector<8x128xf32>
    %30 = arith.addf %27, %29 : vector<8x128xf32>
    %cst_23 = arith.constant 0.000000e+00 : f32
    %31 = vector.broadcast %cst_23 : f32 to vector<8x128xf32>
    %32 = arith.maximumf %30, %31 : vector<8x128xf32>
    %33 = arith.truncf %32 : vector<8x128xf32> to vector<8x128xbf16>
    %c0_24 = arith.constant 0 : index
    %c0_25 = arith.constant 0 : index
    %34 = vector.load %arg10[%c0_24, %c0_25] : memref<128x128xbf16, #tpu.memory_space<vmem>>, vector<128x128xbf16>
    %cst_26 = arith.constant dense<0.000000e+00> : vector<8x128xf32>
    %35 = tpu.matmul %33, %34, %cst_26 {dimension_numbers = #tpu.dot_dimension_numbers<[1], [0], [0], [1], [0, 0, 1, 1], [], []>} : vector<8x128xbf16>, vector<128x128xbf16>, vector<8x128xf32> -> vector<8x128xf32>
    %c0_27 = arith.constant 0 : index
    %c0_28 = arith.constant 0 : index
    %36 = vector.load %arg11[%c0_27, %c0_28] : memref<1x128xf32, #tpu.memory_space<vmem>>, vector<1x128xf32>
    %37 = vector.broadcast %36 : vector<1x128xf32> to vector<8x128xf32>
    %38 = arith.addf %35, %37 : vector<8x128xf32>
    %cst_29 = arith.constant 0.000000e+00 : f32
    %39 = vector.broadcast %cst_29 : f32 to vector<8x128xf32>
    %40 = arith.maximumf %38, %39 : vector<8x128xf32>
    %c0_30 = arith.constant 0 : index
    %c0_31 = arith.constant 0 : index
    %41 = vector.load %arg12[%c0_30, %c0_31] : memref<8x128xf32, #tpu.memory_space<vmem>>, vector<8x128xf32>
    tpu.vector_store %arg12[%c0_30, %c0_31], %40 {strides = array<i32>} : memref<8x128xf32, #tpu.memory_space<vmem>>, vector<8x128xf32>,
    return
  }
  func.func @transform_0(%arg0: i32) -> (i32, i32) {
    %c0_i32 = arith.constant 0 : i32
    %c0_i32_0 = arith.constant 0 : i32
    return %arg0, %c0_i32 : i32, i32
  }
  func.func @transform_1(%arg0: i32) -> (i32, i32) {
    %c0_i32 = arith.constant 0 : i32
    %c0_i32_0 = arith.constant 0 : i32
    %c0_i32_1 = arith.constant 0 : i32
    return %c0_i32, %c0_i32_0 : i32, i32
  }
  func.func @transform_2(%arg0: i32) -> (i32, i32) {
    %c0_i32 = arith.constant 0 : i32
    %c0_i32_0 = arith.constant 0 : i32
    %c0_i32_1 = arith.constant 0 : i32
    return %c0_i32, %c0_i32_0 : i32, i32
  }
  func.func @transform_3(%arg0: i32) -> (i32, i32) {
    %c0_i32 = arith.constant 0 : i32
    %c0_i32_0 = arith.constant 0 : i32
    %c0_i32_1 = arith.constant 0 : i32
    return %c0_i32, %c0_i32_0 : i32, i32
  }
  func.func @transform_4(%arg0: i32) -> (i32, i32) {
    %c0_i32 = arith.constant 0 : i32
    %c0_i32_0 = arith.constant 0 : i32
    %c0_i32_1 = arith.constant 0 : i32
    return %c0_i32, %c0_i32_0 : i32, i32
  }
  func.func @transform_5(%arg0: i32) -> (i32, i32) {
    %c0_i32 = arith.constant 0 : i32
    %c0_i32_0 = arith.constant 0 : i32
    %c0_i32_1 = arith.constant 0 : i32
    return %c0_i32, %c0_i32_0 : i32, i32
  }
  func.func @transform_6(%arg0: i32) -> (i32, i32) {
    %c0_i32 = arith.constant 0 : i32
    %c0_i32_0 = arith.constant 0 : i32
    %c0_i32_1 = arith.constant 0 : i32
    return %c0_i32, %c0_i32_0 : i32, i32
  }
  func.func @transform_7(%arg0: i32) -> (i32, i32) {
    %c0_i32 = arith.constant 0 : i32
    %c0_i32_0 = arith.constant 0 : i32
    %c0_i32_1 = arith.constant 0 : i32
    return %c0_i32, %c0_i32_0 : i32, i32
  }
  func.func @transform_8(%arg0: i32) -> (i32, i32) {
    %c0_i32 = arith.constant 0 : i32
    %c0_i32_0 = arith.constant 0 : i32
    %c0_i32_1 = arith.constant 0 : i32
    return %c0_i32, %c0_i32_0 : i32, i32
  }
  func.func @transform_9(%arg0: i32) -> (i32, i32) {
    %c0_i32 = arith.constant 0 : i32
    %c0_i32_0 = arith.constant 0 : i32
    %c0_i32_1 = arith.constant 0 : i32
    return %c0_i32, %c0_i32_0 : i32, i32
  }
  func.func @transform_10(%arg0: i32) -> (i32, i32) {
    %c0_i32 = arith.constant 0 : i32
    %c0_i32_0 = arith.constant 0 : i32
    %c0_i32_1 = arith.constant 0 : i32
    return %c0_i32, %c0_i32_0 : i32, i32
  }
  func.func @transform_11(%arg0: i32) -> (i32, i32) {
    %c0_i32 = arith.constant 0 : i32
    %c0_i32_0 = arith.constant 0 : i32
    return %arg0, %c0_i32 : i32, i32
  }
}

</mosaic_0001>

<bundles_post_ra>
// kernel: dgcnn_forward.4
= control target key start
LH: loop header
LB: loop body
LE: loop exit
PB: predicated region body
PF: predicated region fallthrough
CT: control target
= control target key end

     0   :  { %v347_v0 = vmov 0.0   ;;  %vm348_vm0 = vmmov 0   ;;  %s448_s3 = inlined_call_operand.vmem [shape: bf16[128,128], index: 3, kind: input, shape index: {}]   ;;  %s449_s2 = inlined_call_operand.vmem [shape: bf16[128,128], index: 2, kind: input, shape index: {}]   ;;  %s450_s1 = inlined_call_operand.vmem [shape: f32[16,128], index: 1, kind: input, shape index: {}]   ;;  %s451_s0 = inlined_call_operand.vmem [shape: f32[16,128], index: 0, kind: input, shape index: {}]   ;;  %s452_s4 = inlined_call_operand.vmem [shape: f32[1,128], index: 4, kind: input, shape index: {}]   ;;  %s453_s5 = inlined_call_operand.vmem [shape: f32[16,128], index: 5, kind: output, shape index: {}]  }
   0x1   :  { %289 = vmatprep.subr.bf16.mxu0 %v347_v0  ;;  %309 = vmatprep.subr.bf16.mxu1 %v347_v0  ;;  %v331_v1 = vld [vmem:[%s448_s3 + $0x38] sm:$0xff]   ;;  %v333_v3 = vld [vmem:[%s448_s3 + $0x30] sm:$0xff]   ;;  %v335_v5 = vld [vmem:[%s448_s3 + $0x28] sm:$0xff]  }
   0x2   :  { %v332_v2 = vld [vmem:[%s449_s2 + $0x38] sm:$0xff]   ;;  %305 = vmatprep.mubr.msk.bf16.mxu0 %vm348_vm0, %v347_v0  ;;  %325 = vmatprep.mubr.msk.bf16.mxu1 %vm348_vm0, %v347_v0  ;;  %v334_v4 = vld [vmem:[%s449_s2 + $0x30] sm:$0xff]   ;;  %v336_v6 = vld [vmem:[%s449_s2 + $0x28] sm:$0xff]  }
   0x3   :  { %290 = vmatpush3.bf16.msra.mxu0 %v331_v1  ;;  %310 = vmatpush3.bf16.msra.mxu1 %v332_v2  ;;  %v337_v7 = vld [vmem:[%s448_s3 + $0x20] sm:$0xff]   ;;  %v339_v9 = vld [vmem:[%s448_s3 + $0x18] sm:$0xff]   ;;  %v341_v11 = vld [vmem:[%s448_s3 + $0x10] sm:$0xff]  }
   0x4   :  { %291 = vmatprep.subr.bf16.mxu0 %v347_v0  ;;  %311 = vmatprep.subr.bf16.mxu1 %v347_v0  ;;  %v338_v8 = vld [vmem:[%s449_s2 + $0x20] sm:$0xff]   ;;  %v340_v10 = vld [vmem:[%s449_s2 + $0x18] sm:$0xff]   ;;  %v342_v12 = vld [vmem:[%s449_s2 + $0x10] sm:$0xff]  }
   0x5   :  { %v343_v13 = vld [vmem:[%s448_s3 + $0x8] sm:$0xff]   ;;  %v345_v15 = vld [vmem:[%s448_s3] sm:$0xff]  }
   0x6   :  { %v344_v14 = vld [vmem:[%s449_s2 + $0x8] sm:$0xff]   ;;  %v24_v16 = vld [vmem:[%s450_s1] sm:$0xff] }
   0x7   :  { %292 = vmatpush3.bf16.msra.mxu0 %v333_v3  ;;  %312 = vmatpush3.bf16.msra.mxu1 %v334_v4  ;;  %v25_v17 = vld [vmem:[%s450_s1 + $0x8] sm:$0xff]  ;;  %v346_v18 = vld [vmem:[%s449_s2] sm:$0xff]  }
   0x8   :  { %293 = vmatprep.subr.bf16.mxu0 %v347_v0  ;;  %313 = vmatprep.subr.bf16.mxu1 %v347_v0  ;;  %v21_v19 = vld [vmem:[%s451_s0] sm:$0xff]  ;;  %v22_v20 = vld [vmem:[%s451_s0 + $0x8] sm:$0xff]  ;;  %v26_v21 = vpack.c.bf16 %v25_v17, %v24_v16 }
   0x9   :  { %v23_v22 = vpack.c.bf16 %v22_v20, %v21_v19  ;;  %v270_v25 = vld [vmem:[%s452_s4] ss:$0 sm:$0xff] }
   0xb   :  { %294 = vmatpush3.bf16.msra.mxu0 %v335_v5  ;;  %314 = vmatpush3.bf16.msra.mxu1 %v336_v6 }
   0xc   :  { %295 = vmatprep.subr.bf16.mxu0 %v347_v0  ;;  %315 = vmatprep.subr.bf16.mxu1 %v347_v0 }
   0xf   :  { %296 = vmatpush3.bf16.msra.mxu0 %v337_v7  ;;  %316 = vmatpush3.bf16.msra.mxu1 %v338_v8 }
  0x10   :  { %297 = vmatprep.subr.bf16.mxu0 %v347_v0  ;;  %317 = vmatprep.subr.bf16.mxu1 %v347_v0 }
  0x13   :  { %298 = vmatpush3.bf16.msra.mxu0 %v339_v9  ;;  %318 = vmatpush3.bf16.msra.mxu1 %v340_v10 }
  0x14   :  { %299 = vmatprep.subr.bf16.mxu0 %v347_v0  ;;  %319 = vmatprep.subr.bf16.mxu1 %v347_v0 }
  0x17   :  { %300 = vmatpush3.bf16.msra.mxu0 %v341_v11  ;;  %320 = vmatpush3.bf16.msra.mxu1 %v342_v12 }
  0x18   :  { %301 = vmatprep.subr.bf16.mxu0 %v347_v0  ;;  %321 = vmatprep.subr.bf16.mxu1 %v347_v0 }
  0x1b   :  { %302 = vmatpush3.bf16.msra.mxu0 %v343_v13  ;;  %322 = vmatpush3.bf16.msra.mxu1 %v344_v14 }
  0x1c   :  { %303 = vmatprep.subr.bf16.mxu0 %v347_v0  ;;  %323 = vmatprep.subr.bf16.mxu1 %v347_v0 }
  0x1f   :  { %304 = vmatpush3.bf16.msra.mxu0 %v345_v15  ;;  %324 = vmatpush3.bf16.msra.mxu1 %v346_v18 }
  0x22   :  { %306 = vmatmul.mubr.bf16.vlgmr.msra.gmra.mxu0 %v26_v21  ;;  %326 = vmatmul.mubr.bf16.vlgmr.msra.gmra.mxu1 %v23_v22 }
  0xe2   :  { %v141_v23 = vpop.f32.mrf.mxu0  ;;  %v230_v24 = vpop.f32.mrf.mxu1 }
  0xe3   :  { %v231_v26 = vadd.f32 %v230_v24, %v141_v23 }
  0xe4   :  { %v307_v27 = vpop.f32.mrf.mxu0  ;;  %v327_v28 = vpop.f32.mrf.mxu1 }
  0xe5   :  { %v244_v29 = vadd.f32 %v270_v25, %v231_v26 }
  0xe6   :  { %v144_v30 = vpop.f32.mrf.mxu0  ;;  %v233_v31 = vpop.f32.mrf.mxu1 }
  0xe7   :  { %v246_v32 = vmax.f32 %v244_v29, 0.0  ;;  %v234_v33 = vadd.f32 %v233_v31, %v144_v30 }
  0xe8   :  { %v308_v34 = vpop.f32.mrf.mxu0  ;;  %v328_v35 = vpop.f32.mrf.mxu1 }
  0xe9   :  { %248 = vst [vmem:[%s453_s5] sm:$0xff] %v246_v32  ;;  %v245_v36 = vadd.f32 %v270_v25, %v234_v33 }
  0xeb   :  { %v247_v37 = vmax.f32 %v245_v36, 0.0 }
  0xed   :  { %249 = vst [vmem:[%s453_s5 + $0x8] sm:$0xff] %v247_v37 }

// kernel: dgcnn_forward.7
= control target key start
LH: loop header
LB: loop body
LE: loop exit
PB: predicated region body
PF: predicated region fallthrough
CT: control target
= control target key end

     0   :  { %vm1258_vm0 = vmmov 0   ;;  %s1649_s1 = inlined_call_operand.vmem [shape: bf16[256,256], index: 1, kind: input, shape index: {}]   ;;  %s1650_s0 = inlined_call_operand.vmem [shape: f32[8,256], index: 0, kind: input, shape index: {}]   ;;  %s1651_s3 = inlined_call_operand.vmem [shape: bf16[256,256], index: 3, kind: input, shape index: {}]   ;;  %s1652_s5 = inlined_call_operand.vmem [shape: bf16[256,128], index: 5, kind: input, shape index: {}]   ;;  %s1653_s2 = inlined_call_operand.vmem [shape: f32[1,256], index: 2, kind: input, shape index: {}]   ;;  %s1654_s7 = inlined_call_operand.vmem [shape: bf16[128,128], index: 7, kind: input, shape index: {}]   ;;  %s1655_s4 = inlined_call_operand.vmem [shape: f32[1,256], index: 4, kind: input, shape index: {}]   ;;  %s1656_s9 = inlined_call_operand.vmem [shape: bf16[128,128], index: 9, kind: input, shape index: {}]   ;;  %s1657_s6 = inlined_call_operand.vmem [shape: f32[1,128], index: 6, kind: input, shape index: {}]   ;;  %s1658_s8 = inlined_call_operand.vmem [shape: f32[1,128], index: 8, kind: input, shape index: {}]   ;;  %s1659_s10 = inlined_call_operand.vmem [shape: f32[1,128], index: 10, kind: input, shape index: {}]   ;;  %s1660_s11 = inlined_call_operand.vmem [shape: f32[8,128], index: 11, kind: output, shape index: {}]  }
   0x1   :  { %v1129_v0 = vld [vmem:[%s1649_s1 + $0x74] ss:$8 sps:$4 sm:$0xff]   ;;  %v1131_v1 = vld [vmem:[%s1649_s1 + $0x70] ss:$8 sps:$4 sm:$0xff]   ;;  %v1132_v2 = vld [vmem:[%s1649_s1 + $0x64] ss:$8 sps:$4 sm:$0xff]  }
   0x2   :  { %247 = vmatprep.subr.bf16.mxu0 %v1129_v0  ;;  %v1134_v3 = vld [vmem:[%s1649_s1 + $0x60] ss:$8 sps:$4 sm:$0xff]   ;;  %v1135_v4 = vld [vmem:[%s1649_s1 + $0x54] ss:$8 sps:$4 sm:$0xff]   ;;  %v1137_v5 = vld [vmem:[%s1649_s1 + $0x50] ss:$8 sps:$4 sm:$0xff]  }
   0x3   :  { %248 = vmatpush1.bf16.msra.mxu0 %v1131_v1  ;;  %v1138_v6 = vld [vmem:[%s1649_s1 + $0x44] ss:$8 sps:$4 sm:$0xff]   ;;  %v1140_v7 = vld [vmem:[%s1649_s1 + $0x40] ss:$8 sps:$4 sm:$0xff]   ;;  %v1141_v8 = vld [vmem:[%s1649_s1 + $0x34] ss:$8 sps:$4 sm:$0xff]  }
   0x4   :  { %249 = vmatprep.subr.bf16.mxu0 %v1132_v2  ;;  %v1143_v9 = vld [vmem:[%s1649_s1 + $0x30] ss:$8 sps:$4 sm:$0xff]   ;;  %v1144_v10 = vld [vmem:[%s1649_s1 + $0x24] ss:$8 sps:$4 sm:$0xff]   ;;  %v1146_v11 = vld [vmem:[%s1649_s1 + $0x20] ss:$8 sps:$4 sm:$0xff]  }
   0x5   :  { %v1147_v12 = vld [vmem:[%s1649_s1 + $0x14] ss:$8 sps:$4 sm:$0xff]   ;;  %v1149_v13 = vld [vmem:[%s1649_s1 + $0x10] ss:$8 sps:$4 sm:$0xff]   ;;  %v40_v14 = vld [vmem:[%s1650_s0 + $0x8] sm:$0xff] }
   0x6   :  { %v42_v15 = vpack.c.bf16 %v40_v14, %v40_v14  ;;  %v1177_v16 = vld [vmem:[%s1651_s3 + $0x74] ss:$8 sps:$4 sm:$0xff]   ;;  %v1179_v17 = vld [vmem:[%s1651_s3 + $0x70] ss:$8 sps:$4 sm:$0xff]   ;;  %v1150_v18 = vld [vmem:[%s1649_s1 + $0x4] ss:$8 sps:$4 sm:$0xff]  }
   0x7   :  { %250 = vmatpush1.bf16.msra.mxu0 %v1134_v3  ;;  %v1180_v19 = vld [vmem:[%s1651_s3 + $0x64] ss:$8 sps:$4 sm:$0xff]   ;;  %v1152_v20 = vld [vmem:[%s1649_s1] ss:$8 sps:$4 sm:$0xff]   ;;  %496 = vmatprep.subr.bf16.mxu1 %v1177_v16  ;;  %v1183_v22 = vld [vmem:[%s1651_s3 + $0x54] ss:$8 sps:$4 sm:$0xff]   ;;  %v77_v16 = vlaneseq }
   0x8   :  { %251 = vmatprep.subr.bf16.mxu0 %v1135_v4  ;;  %279 = vmatprep.mubr.bf16.mxu0 %v42_v15  ;;  %v1182_v21 = vld [vmem:[%s1651_s3 + $0x60] ss:$8 sps:$4 sm:$0xff]   ;;  %v1153_v23 = vld [vmem:[%s1649_s1 + $0xf4] ss:$8 sps:$4 sm:$0xff]   ;;  %v1155_v24 = vld [vmem:[%s1649_s1 + $0xf0] ss:$8 sps:$4 sm:$0xff]  }
   0x9   :  { %497 = vmatpush1.bf16.msra.mxu1 %v1179_v17  ;;  %v1185_v25 = vld [vmem:[%s1651_s3 + $0x50] ss:$8 sps:$4 sm:$0xff]   ;;  %v1186_v26 = vld [vmem:[%s1651_s3 + $0x44] ss:$8 sps:$4 sm:$0xff]   ;;  %v1158_v28 = vld [vmem:[%s1649_s1 + $0xe0] ss:$8 sps:$4 sm:$0xff]  }
   0xa   :  { %498 = vmatprep.subr.bf16.mxu1 %v1180_v19  ;;  %v1156_v27 = vld [vmem:[%s1649_s1 + $0xe4] ss:$8 sps:$4 sm:$0xff]   ;;  %v1188_v29 = vld [vmem:[%s1651_s3 + $0x40] ss:$8 sps:$4 sm:$0xff]   ;;  %v1189_v30 = vld [vmem:[%s1651_s3 + $0x34] ss:$8 sps:$4 sm:$0xff]  }
   0xb   :  { %252 = vmatpush1.bf16.msra.mxu0 %v1137_v5  ;;  %v1159_v31 = vld [vmem:[%s1649_s1 + $0xd4] ss:$8 sps:$4 sm:$0xff]   ;;  %v1161_v32 = vld [vmem:[%s1649_s1 + $0xd0] ss:$8 sps:$4 sm:$0xff]   ;;  %v1192_v34 = vld [vmem:[%s1651_s3 + $0x24] ss:$8 sps:$4 sm:$0xff]  }
   0xc   :  { %253 = vmatprep.subr.bf16.mxu0 %v1138_v6  ;;  %v1191_v33 = vld [vmem:[%s1651_s3 + $0x30] ss:$8 sps:$4 sm:$0xff]   ;;  %v1162_v35 = vld [vmem:[%s1649_s1 + $0xc4] ss:$8 sps:$4 sm:$0xff]   ;;  %v1194_v36 = vld [vmem:[%s1651_s3 + $0x20] ss:$8 sps:$4 sm:$0xff]  }
   0xd   :  { %499 = vmatpush1.bf16.msra.mxu1 %v1182_v21  ;;  %v1164_v37 = vld [vmem:[%s1649_s1 + $0xc0] ss:$8 sps:$4 sm:$0xff]   ;;  %v1195_v38 = vld [vmem:[%s1651_s3 + $0x14] ss:$8 sps:$4 sm:$0xff]   ;;  %v1197_v40 = vld [vmem:[%s1651_s3 + $0x10] ss:$8 sps:$4 sm:$0xff]  }
   0xe   :  { %500 = vmatprep.subr.bf16.mxu1 %v1183_v22  ;;  %v1165_v39 = vld [vmem:[%s1649_s1 + $0xb4] ss:$8 sps:$4 sm:$0xff]   ;;  %v1167_v41 = vld [vmem:[%s1649_s1 + $0xb0] ss:$8 sps:$4 sm:$0xff]   ;;  %v1198_v42 = vld [vmem:[%s1651_s3 + $0x4] ss:$8 sps:$4 sm:$0xff]  }
   0xf   :  { %254 = vmatpush1.bf16.msra.mxu0 %v1140_v7  ;;  %v1168_v43 = vld [vmem:[%s1649_s1 + $0xa4] ss:$8 sps:$4 sm:$0xff]   ;;  %v1200_v44 = vld [vmem:[%s1651_s3] ss:$8 sps:$4 sm:$0xff]   ;;  %v1201_v46 = vld [vmem:[%s1651_s3 + $0xf4] ss:$8 sps:$4 sm:$0xff]  }
  0x10   :  { %255 = vmatprep.subr.bf16.mxu0 %v1141_v8  ;;  %v1170_v45 = vld [vmem:[%s1649_s1 + $0xa0] ss:$8 sps:$4 sm:$0xff]   ;;  %v1171_v47 = vld [vmem:[%s1649_s1 + $0x94] ss:$8 sps:$4 sm:$0xff]   ;;  %v1203_v48 = vld [vmem:[%s1651_s3 + $0xf0] ss:$8 sps:$4 sm:$0xff]  }
  0x11   :  { %501 = vmatpush1.bf16.msra.mxu1 %v1185_v25  ;;  %v1173_v49 = vld [vmem:[%s1649_s1 + $0x90] ss:$8 sps:$4 sm:$0xff]   ;;  %v1204_v50 = vld [vmem:[%s1651_s3 + $0xe4] ss:$8 sps:$4 sm:$0xff]   ;;  %v1206_v52 = vld [vmem:[%s1651_s3 + $0xe0] ss:$8 sps:$4 sm:$0xff]  }
  0x12   :  { %502 = vmatprep.subr.bf16.mxu1 %v1186_v26  ;;  %v1174_v51 = vld [vmem:[%s1649_s1 + $0x84] ss:$8 sps:$4 sm:$0xff]   ;;  %v1176_v53 = vld [vmem:[%s1649_s1 + $0x80] ss:$8 sps:$4 sm:$0xff]   ;;  %v1207_v55 = vld [vmem:[%s1651_s3 + $0xd4] ss:$8 sps:$4 sm:$0xff]  }
  0x13   :  { %256 = vmatpush1.bf16.msra.mxu0 %v1143_v9  ;;  %v39_v54 = vld [vmem:[%s1650_s0] sm:$0xff]  ;;  %v1209_v57 = vld [vmem:[%s1651_s3 + $0xd0] ss:$8 sps:$4 sm:$0xff]   ;;  %v1213_v60 = vld [vmem:[%s1651_s3 + $0xb4] ss:$8 sps:$4 sm:$0xff]   ;;  %v78_v17 = vshrl.u32 %v77_v16, 7 }
  0x14   :  { %257 = vmatprep.subr.bf16.mxu0 %v1144_v10  ;;  %v41_v56 = vpack.c.bf16 %v39_v54, %v39_v54  ;;  %v1210_v58 = vld [vmem:[%s1651_s3 + $0xc4] ss:$8 sps:$4 sm:$0xff]   ;;  %v1212_v59 = vld [vmem:[%s1651_s3 + $0xc0] ss:$8 sps:$4 sm:$0xff]   ;;  %v1215_v61 = vld [vmem:[%s1651_s3 + $0xb0] ss:$8 sps:$4 sm:$0xff]  }
  0x15   :  { %503 = vmatpush1.bf16.msra.mxu1 %v1188_v29  ;;  %v1216_v62 = vld [vmem:[%s1651_s3 + $0xa4] ss:$8 sps:$4 sm:$0xff]   ;;  %v1218_v63 = vld [vmem:[%s1651_s3 + $0xa0] ss:$8 sps:$4 sm:$0xff]   ;;  %v1219_v0 = vld [vmem:[%s1651_s3 + $0x94] ss:$8 sps:$4 sm:$0xff]  }
  0x16   :  { %504 = vmatprep.subr.bf16.mxu1 %v1189_v30  ;;  %v1221_v1 = vld [vmem:[%s1651_s3 + $0x90] ss:$8 sps:$4 sm:$0xff]   ;;  %v1222_v2 = vld [vmem:[%s1651_s3 + $0x84] ss:$8 sps:$4 sm:$0xff]   ;;  %v1224_v3 = vld [vmem:[%s1651_s3 + $0x80] ss:$8 sps:$4 sm:$0xff]  }
  0x17   :  { %258 = vmatpush1.bf16.msra.mxu0 %v1146_v11  ;;  %v1225_v4 = vld [vmem:[%s1652_s5 + $0x78] sm:$0xff]   ;;  %v1227_v6 = vld [vmem:[%s1652_s5 + $0x70] sm:$0xff]   ;;  %v1229_v8 = vld [vmem:[%s1652_s5 + $0x68] sm:$0xff]  }
  0x18   :  { %259 = vmatprep.subr.bf16.mxu0 %v1147_v12  ;;  %v1226_v5 = vld [vmem:[%s1652_s5 + $0x38] sm:$0xff]   ;;  %v1228_v7 = vld [vmem:[%s1652_s5 + $0x30] sm:$0xff]   ;;  %v1230_v9 = vld [vmem:[%s1652_s5 + $0x28] sm:$0xff]  }
  0x19   :  { %505 = vmatpush1.bf16.msra.mxu1 %v1191_v33  ;;  %v1231_v10 = vld [vmem:[%s1652_s5 + $0x60] sm:$0xff]   ;;  %v1233_v12 = vld [vmem:[%s1652_s5 + $0x58] sm:$0xff]   ;;  %v1235_v14 = vld [vmem:[%s1652_s5 + $0x50] sm:$0xff]  }
  0x1a   :  { %506 = vmatprep.subr.bf16.mxu1 %v1192_v34  ;;  %v1232_v11 = vld [vmem:[%s1652_s5 + $0x20] sm:$0xff]   ;;  %v1236_v15 = vld [vmem:[%s1652_s5 + $0x10] sm:$0xff]   ;;  %v1237_v33 = vld [vmem:[%s1652_s5 + $0x48] sm:$0xff]  }
  0x1b   :  { %260 = vmatpush1.bf16.msra.mxu0 %v1149_v13  ;;  %v1234_v13 = vld [vmem:[%s1652_s5 + $0x18] sm:$0xff]   ;;  %v75_v19 = vld [vmem:[%s1653_s2] sm:$0x3]  ;;  %v1238_v34 = vld [vmem:[%s1652_s5 + $0x8] sm:$0xff]  }
  0x1c   :  { %261 = vmatprep.subr.bf16.mxu0 %v1150_v18  ;;  %v79_v18 = vsub.s32 0, %v78_v17 }
  0x1d   :  { %507 = vmatpush1.bf16.msra.mxu1 %v1194_v36  ;;  %v1240_v36 = vld [vmem:[%s1652_s5] sm:$0xff]  }
  0x1e   :  { %508 = vmatprep.subr.bf16.mxu1 %v1195_v38  ;;  %v80_v21 = vrot.slane %v75_v19, %v79_v18  ;;  %v1241_v38 = vld [vmem:[%s1654_s7 + $0x38] sm:$0xff]  }
  0x1f   :  { %262 = vmatpush1.bf16.msra.mxu0 %v1152_v20  ;;  %v83_v20 = vsub.s32 1, %v78_v17 }
  0x20   :  { %263 = vmatprep.subr.bf16.mxu0 %v1153_v23 }
  0x21   :  { %509 = vmatpush1.bf16.msra.mxu1 %v1197_v40  ;;  %v84_v22 = vrot.slane %v75_v19, %v83_v20  ;;  %v1243_v40 = vld [vmem:[%s1654_s7 + $0x28] sm:$0xff]  }
  0x22   :  { %510 = vmatprep.subr.bf16.mxu1 %v1198_v42  ;;  %v1245_v42 = vld [vmem:[%s1654_s7 + $0x18] sm:$0xff]  }
  0x23   :  { %264 = vmatpush2.bf16.msra.mxu0 %v1155_v24 }
  0x24   :  { %265 = vmatprep.subr.bf16.mxu0 %v1156_v27 }
  0x25   :  { %511 = vmatpush1.bf16.msra.mxu1 %v1200_v44 }
  0x26   :  { %512 = vmatprep.subr.bf16.mxu1 %v1201_v46 }
  0x27   :  { %266 = vmatpush2.bf16.msra.mxu0 %v1158_v28 }
  0x28   :  { %267 = vmatprep.subr.bf16.mxu0 %v1159_v31 }
  0x29   :  { %513 = vmatpush2.bf16.msra.mxu1 %v1203_v48 }
  0x2a   :  { %514 = vmatprep.subr.bf16.mxu1 %v1204_v50 }
  0x2b   :  { %268 = vmatpush2.bf16.msra.mxu0 %v1161_v32 }
  0x2c   :  { %269 = vmatprep.subr.bf16.mxu0 %v1162_v35  ;;  %v1239_v35 = vld [vmem:[%s1652_s5 + $0x40] sm:$0xff]  }
  0x2d   :  { %515 = vmatpush2.bf16.msra.mxu1 %v1206_v52 }
  0x2e   :  { %516 = vmatprep.subr.bf16.mxu1 %v1207_v55 }
  0x2f   :  { %270 = vmatpush2.bf16.msra.mxu0 %v1164_v37  ;;  %v1257_v37 = vmov 0.0  }
  0x30   :  { %271 = vmatprep.subr.bf16.mxu0 %v1165_v39  ;;  %v1242_v39 = vld [vmem:[%s1654_s7 + $0x30] sm:$0xff]  }
  0x31   :  { %517 = vmatpush2.bf16.msra.mxu1 %v1209_v57  ;;  %v1247_v57 = vld [vmem:[%s1654_s7 + $0x8] sm:$0xff]  }
  0x32   :  { %518 = vmatprep.subr.bf16.mxu1 %v1210_v58  ;;  %v1248_v58 = vld [vmem:[%s1654_s7] sm:$0xff]  }
  0x33   :  { %272 = vmatpush2.bf16.msra.mxu0 %v1167_v41  ;;  %v1244_v41 = vld [vmem:[%s1654_s7 + $0x20] sm:$0xff]  }
  0x34   :  { %273 = vmatprep.subr.bf16.mxu0 %v1168_v43  ;;  %v324_v43 = vld [vmem:[%s1655_s4] sm:$0x3] }
  0x35   :  { %519 = vmatpush2.bf16.msra.mxu1 %v1212_v59  ;;  %v329_v44 = vrot.slane %v324_v43, %v79_v18  ;;  %v1249_v59 = vld [vmem:[%s1656_s9 + $0x38] sm:$0xff]  }
  0x36   :  { %520 = vmatprep.subr.bf16.mxu1 %v1213_v60  ;;  %v1250_v60 = vld [vmem:[%s1656_s9 + $0x30] sm:$0xff]  }
  0x37   :  { %274 = vmatpush2.bf16.msra.mxu0 %v1170_v45  ;;  %v333_v45 = vrot.slane %v324_v43, %v83_v20  ;;  %v1038_v20 = vld [vmem:[%s1659_s10] ss:$0 sm:$0xff] }
  0x38   :  { %275 = vmatprep.subr.bf16.mxu0 %v1171_v47 }
  0x39   :  { %521 = vmatpush2.bf16.msra.mxu1 %v1215_v61  ;;  %v1251_v61 = vld [vmem:[%s1656_s9 + $0x28] sm:$0xff]  }
  0x3a   :  { %522 = vmatprep.subr.bf16.mxu1 %v1216_v62  ;;  %v1252_v62 = vld [vmem:[%s1656_s9 + $0x20] sm:$0xff]  }
  0x3b   :  { %276 = vmatpush2.bf16.msra.mxu0 %v1173_v49 }
  0x3c   :  { %277 = vmatprep.subr.bf16.mxu0 %v1174_v51 }
  0x3d   :  { %523 = vmatpush2.bf16.msra.mxu1 %v1218_v63  ;;  %v1253_v63 = vld [vmem:[%s1656_s9 + $0x18] sm:$0xff]  }
  0x3e   :  { %524 = vmatprep.subr.bf16.mxu1 %v1219_v0  ;;  %v1254_v0 = vld [vmem:[%s1656_s9 + $0x10] sm:$0xff]  }
  0x3f   :  { %278 = vmatpush2.bf16.msra.mxu0 %v1176_v53 }
  0x40   :  { %1047 = vmatprep.subr.bf16.mxu0 %v1225_v4 }
  0x41   :  { %525 = vmatpush2.bf16.msra.mxu1 %v1221_v1 }
  0x42   :  { %280 = vmatmul.mubr.bf16.vlgmr.msra.gmra.mxu0 %v41_v56  ;;  %526 = vmatprep.subr.bf16.mxu1 %v1222_v2  ;;  %v1246_v56 = vld [vmem:[%s1654_s7 + $0x10] sm:$0xff]   ;;  %v1012_v2 = vld [vmem:[%s1657_s6] ss:$0 sm:$0xff] }
  0x43   :  { %1048 = vmatpush3.bf16.msra.mxu0 %v1226_v5 }
  0x44   :  { %1049 = vmatprep.subr.bf16.mxu0 %v1227_v6 }
  0x45   :  { %527 = vmatpush2.bf16.msra.mxu1 %v1224_v3 }
  0x46   :  { %1087 = vmatprep.subr.bf16.mxu1 %v1257_v37 }
  0x47   :  { %1050 = vmatpush3.bf16.msra.mxu0 %v1228_v7 }
  0x48   :  { %1051 = vmatprep.subr.bf16.mxu0 %v1229_v8 }
  0x4b   :  { %1052 = vmatpush3.bf16.msra.mxu0 %v1230_v9 }
  0x4c   :  { %1053 = vmatprep.subr.bf16.mxu0 %v1231_v10  ;;  %v1255_v10 = vld [vmem:[%s1656_s9 + $0x8] sm:$0xff]  }
  0x4f   :  { %1054 = vmatpush3.bf16.msra.mxu0 %v1232_v11  ;;  %v1256_v11 = vld [vmem:[%s1656_s9] sm:$0xff]  }
  0x50   :  { %1055 = vmatprep.subr.bf16.mxu0 %v1233_v12  ;;  %v1029_v12 = vld [vmem:[%s1658_s8] ss:$0 sm:$0xff] }
  0x53   :  { %1056 = vmatpush3.bf16.msra.mxu0 %v1234_v13 }
  0x54   :  { %1057 = vmatprep.subr.bf16.mxu0 %v1235_v14 }
  0x57   :  { %1058 = vmatpush3.bf16.msra.mxu0 %v1236_v15 }
  0x58   :  { %1059 = vmatprep.subr.bf16.mxu0 %v1237_v33 }
  0x5b   :  { %1060 = vmatpush3.bf16.msra.mxu0 %v1238_v34 }
  0x5c   :  { %1061 = vmatprep.subr.bf16.mxu0 %v1239_v35 }
  0x5f   :  { %1062 = vmatpush3.bf16.msra.mxu0 %v1240_v36 }
  0x60   :  { %1107 = vmatprep.subr.bf16.mxu0 %v1257_v37 }
 0x102   :  { %v281_v23 = vpop.f32.mrf.mxu0 }
 0x103   :  { %v282_v24 = vadd.f32 %v281_v23, %v80_v21 }
 0x104   :  { %v283_v25 = vpop.f32.mrf.mxu0 }
 0x105   :  { %v284_v26 = vadd.f32 %v283_v25, %v84_v22  ;;  %v288_v27 = vmax.f32 %v282_v24, 0.0 }
 0x106   :  { %v285_v28 = vpop.f32.mrf.mxu0 }
 0x107   :  { %v289_v29 = vmax.f32 %v284_v26, 0.0  ;;  %v290_v32 = vpack.c.bf16 %v288_v27, %v288_v27 }
 0x108   :  { %v286_v30 = vpop.f32.mrf.mxu0 }
 0x109   :  { %v291_v31 = vpack.c.bf16 %v289_v29, %v289_v29 }
 0x10b   :  { %528 = vmatprep.mubr.bf16.mxu1 %v291_v31 }
 0x10c   :  { %529 = vmatmul.mubr.bf16.vlgmr.msra.gmra.mxu1 %v290_v32 }
 0x10d   :  { %1088 = vmatpush3.bf16.msra.mxu1 %v1241_v38  ;;  %1103 = vmatprep.mubr.msk.bf16.mxu1 %vm1258_vm0, %v1257_v37 }
 0x10e   :  { %1089 = vmatprep.subr.bf16.mxu1 %v1257_v37 }
 0x111   :  { %1090 = vmatpush3.bf16.msra.mxu1 %v1242_v39 }
 0x112   :  { %1091 = vmatprep.subr.bf16.mxu1 %v1257_v37 }
 0x115   :  { %1092 = vmatpush3.bf16.msra.mxu1 %v1243_v40 }
 0x116   :  { %1093 = vmatprep.subr.bf16.mxu1 %v1257_v37 }
 0x119   :  { %1094 = vmatpush3.bf16.msra.mxu1 %v1244_v41 }
 0x11a   :  { %1095 = vmatprep.subr.bf16.mxu1 %v1257_v37 }
 0x11d   :  { %1096 = vmatpush3.bf16.msra.mxu1 %v1245_v42 }
 0x11e   :  { %1097 = vmatprep.subr.bf16.mxu1 %v1257_v37 }
 0x121   :  { %1098 = vmatpush3.bf16.msra.mxu1 %v1246_v56 }
 0x122   :  { %1099 = vmatprep.subr.bf16.mxu1 %v1257_v37 }
 0x125   :  { %1100 = vmatpush3.bf16.msra.mxu1 %v1247_v57 }
 0x126   :  { %1101 = vmatprep.subr.bf16.mxu1 %v1257_v37 }
 0x129   :  { %1102 = vmatpush3.bf16.msra.mxu1 %v1248_v58 }
 0x1cc   :  { %v530_v46 = vpop.f32.mrf.mxu1 }
 0x1cd   :  { %v531_v47 = vadd.f32 %v530_v46, %v329_v44 }
 0x1ce   :  { %v532_v48 = vpop.f32.mrf.mxu1 }
 0x1cf   :  { %v533_v49 = vadd.f32 %v532_v48, %v333_v45  ;;  %v537_v50 = vmax.f32 %v531_v47, 0.0 }
 0x1d0   :  { %v534_v51 = vpop.f32.mrf.mxu1 }
 0x1d1   :  { %v538_v52 = vmax.f32 %v533_v49, 0.0  ;;  %v539_v55 = vpack.c.bf16 %v537_v50, %v537_v50 }
 0x1d2   :  { %v535_v53 = vpop.f32.mrf.mxu1 }
 0x1d3   :  { %v540_v54 = vpack.c.bf16 %v538_v52, %v538_v52 }
 0x1d5   :  { %708 = vmatprep.mubr.bf16.mxu0 %v540_v54 }
 0x1d6   :  { %709 = vmatmul.mubr.bf16.vlgmr.msra.gmra.mxu0 %v539_v55 }
 0x1d7   :  { %1123 = vmatprep.mubr.msk.bf16.mxu0 %vm1258_vm0, %v1257_v37  ;;  %1108 = vmatpush3.bf16.msra.mxu0 %v1249_v59 }
 0x1d8   :  { %1109 = vmatprep.subr.bf16.mxu0 %v1257_v37 }
 0x1db   :  { %1110 = vmatpush3.bf16.msra.mxu0 %v1250_v60 }
 0x1dc   :  { %1111 = vmatprep.subr.bf16.mxu0 %v1257_v37 }
 0x1df   :  { %1112 = vmatpush3.bf16.msra.mxu0 %v1251_v61 }
 0x1e0   :  { %1113 = vmatprep.subr.bf16.mxu0 %v1257_v37 }
 0x1e3   :  { %1114 = vmatpush3.bf16.msra.mxu0 %v1252_v62 }
 0x1e4   :  { %1115 = vmatprep.subr.bf16.mxu0 %v1257_v37 }
 0x1e7   :  { %1116 = vmatpush3.bf16.msra.mxu0 %v1253_v63 }
 0x1e8   :  { %1117 = vmatprep.subr.bf16.mxu0 %v1257_v37 }
 0x1eb   :  { %1118 = vmatpush3.bf16.msra.mxu0 %v1254_v0 }
 0x1ec   :  { %1119 = vmatprep.subr.bf16.mxu0 %v1257_v37 }
 0x1ef   :  { %1120 = vmatpush3.bf16.msra.mxu0 %v1255_v10 }
 0x1f0   :  { %1121 = vmatprep.subr.bf16.mxu0 %v1257_v37 }
 0x1f3   :  { %1122 = vmatpush3.bf16.msra.mxu0 %v1256_v11 }
 0x296   :  { %v1063_v1 = vpop.f32.mrf.mxu0 }
 0x298   :  { %v1064_v3 = vpop.f32.mrf.mxu0 }
 0x299   :  { %v1065_v4 = vadd.f32 %v1064_v3, %v1063_v1 }
 0x29a   :  { %v1066_v5 = vpop.f32.mrf.mxu0 }
 0x29b   :  { %v711_v6 = vadd.f32 %v1065_v4, %v1012_v2 }
 0x29c   :  { %v1067_v7 = vpop.f32.mrf.mxu0 }
 0x29d   :  { %v716_v8 = vmax.f32 %v711_v6, 0.0 }
 0x29f   :  { %v717_v9 = vpack.c.bf16 %v716_v8, %v716_v8 }
 0x2a1   :  { %1104 = vmatmul.mubr.bf16.vlgmr.msra.gmra.mxu1 %v717_v9 }
 0x361   :  { %v823_v13 = vpop.f32.mrf.mxu1 }
 0x362   :  { %v824_v14 = vadd.f32 %v1029_v12, %v823_v13 }
 0x363   :  { %v1105_v15 = vpop.f32.mrf.mxu1 }
 0x364   :  { %v829_v16 = vmax.f32 %v824_v14, 0.0 }
 0x365   :  { %v826_v17 = vpop.f32.mrf.mxu1 }
 0x366   :  { %v830_v18 = vpack.c.bf16 %v829_v16, %v829_v16 }
 0x367   :  { %v1106_v19 = vpop.f32.mrf.mxu1 }
 0x368   :  { %1124 = vmatmul.mubr.bf16.vlgmr.msra.gmra.mxu0 %v830_v18 }
 0x428   :  { %v936_v21 = vpop.f32.mrf.mxu0 }
 0x429   :  { %v937_v22 = vadd.f32 %v1038_v20, %v936_v21 }
 0x42a   :  { %v1125_v23 = vpop.f32.mrf.mxu0 }
 0x42b   :  { %v942_v24 = vmax.f32 %v937_v22, 0.0 }
 0x42c   :  { %v939_v25 = vpop.f32.mrf.mxu0 }
 0x42d   :  { %943 = vst [vmem:[%s1660_s11] sm:$0xff] %v942_v24 }
 0x42e   :  { %v1126_v26 = vpop.f32.mrf.mxu0 }

</bundles_post_ra>
